<compile_context>
chip_gen: v5e
topology: v5e:2x2
jax: 0.10.0
libtpu: 0.0.40
codegen_flags: <defaults>
</compile_context>

<pallas_src>
import jax
import jax.numpy as jnp
from jax.experimental import pallas as pl
from jax.experimental.pallas import tpu as pltpu


# ----------------------------------------------------------------------------
# Kernel
# ----------------------------------------------------------------------------
def _grouped_moe_kernel(be_ref, w_ref, x_ref, guw_ref, dw_ref, out_ref, acc_ref):
    f = pl.program_id(1)

    @pl.when(f == 0)
    def _init():
        acc_ref[...] = jnp.zeros_like(acc_ref)

    x = x_ref[...]                                                 # (TT, H)
    # One fused matmul for gate and up (weights pre-interleaved per f-tile).
    gu = jnp.dot(x, guw_ref[...], preferred_element_type=jnp.float32)  # (TT, 2*TF)
    tf = gu.shape[-1] // 2
    gate = gu[:, :tf]
    up = gu[:, tf:]
    act = gate * jax.nn.sigmoid(gate) * up                         # silu(gate) * up
    acc_ref[...] += jnp.dot(act.astype(dw_ref.dtype), dw_ref[...],
                            preferred_element_type=jnp.float32)    # (TT, H)

    @pl.when(f == pl.num_programs(1) - 1)
    def _finalize():
        # Router weight (per assignment row) applied once; padding rows have
        # weight 0 so they contribute nothing after the wrapper scatter.
        out_ref[...] = (acc_ref[...] * w_ref[...]).astype(out_ref.dtype)


# ----------------------------------------------------------------------------
# Tile selection (generation-aware)
# ----------------------------------------------------------------------------
_TT_CANDS = (512, 384, 256, 192, 128, 64, 32, 16, 8)
_TF_CANDS = (2048, 1536, 1024, 768, 512, 384, 256, 128)


def _round_up(x, m):
    return ((x + m - 1) // m) * m


def _vmem_capacity_bytes():
    try:
        info = pltpu.get_tpu_info()
        cap = getattr(info, "vmem_capacity_bytes", None)
        if cap:
            return int(cap)
    except Exception:
        pass
    return 64 * 1024 * 1024  # conservative: v7x has 64 MiB / TensorCore


def _pick_tiles(A, E, H, F, x_isz, w_isz, o_isz, vmem_limit):
    margin = 2 * 1024 * 1024
    budget = max(vmem_limit - margin, 4 * 1024 * 1024)
    # VMEM bytes per token row: double-buffered x block + out block,
    # f32 accumulator, router-weight column.
    act_row = H * (2 * x_isz + 2 * o_isz + 4) + 2 * 4
    # Bigger than ~the per-expert assignment count only adds padding compute
    # in the grouped design (weights per expert are already streamed ~once).
    work_cap = min(512,
                   _round_up(max((A + E - 1) // max(E, 1), 8), 8),
                   _round_up(A, 8))
    tt = 8
    for c in _TT_CANDS:
        if c <= work_cap and c * act_row <= budget // 2:
            tt = c
            break
    rem = budget - tt * act_row
    # Weight VMEM per step: fused gate|up tile (H, 2*TF) + down tile (TF, H),
    # each double-buffered -> 6 * H * TF * itemsize.
    f_cap = _round_up(F, 128)
    feas = [c for c in _TF_CANDS if c <= f_cap and 6 * H * c * w_isz <= rem]
    if not feas:
        tf = 128
    else:
        exact = [c for c in feas if F % c == 0]
        tf = exact[0] if exact else feas[0]
    return tt, tf


# ----------------------------------------------------------------------------
# Wrapper
# ----------------------------------------------------------------------------
def fused_moe(hidden_states, topk_weights, topk_ids,
              gate_up_weights, down_weights, renormalize=False):
    T, H = hidden_states.shape
    E, two_f, _ = gate_up_weights.shape
    F = two_f // 2
    K = topk_ids.shape[1]
    A = T * K

    out_dtype = hidden_states.dtype
    x_isz = hidden_states.dtype.itemsize
    w_isz = gate_up_weights.dtype.itemsize
    o_isz = jnp.dtype(out_dtype).itemsize

    if renormalize:
        topk_weights = topk_weights / jnp.sum(topk_weights, axis=-1, keepdims=True)
    topk_weights = topk_weights.astype(jnp.float32)
    topk_ids = topk_ids.astype(jnp.int32)

    vmem_cap = _vmem_capacity_bytes()
    vmem_limit = int(vmem_cap * 3 // 4)          # ~96 MiB v5e/v6e, ~48 MiB v7x
    TT, TF = _pick_tiles(A, E, H, F, x_isz, w_isz, o_isz, vmem_limit)
    footprint = (TT * H * (2 * x_isz + 2 * o_isz + 4) + 2 * TT * 4
                 + 6 * H * TF * w_isz)
    vmem_limit = int(max(vmem_limit, footprint + 2 * 1024 * 1024))

    F_pad = _round_up(F, TF)
    nf = F_pad // TF

    # ---- one-time weight layout change (do at load time in production) ------
    gate_t = jnp.swapaxes(gate_up_weights[:, :F, :], 1, 2)   # (E, H, F)
    up_t = jnp.swapaxes(gate_up_weights[:, F:, :], 1, 2)     # (E, H, F)
    down_t = jnp.swapaxes(down_weights, 1, 2)                 # (E, F, H)
    if F_pad != F:
        gate_t = jnp.pad(gate_t, ((0, 0), (0, 0), (0, F_pad - F)))
        up_t = jnp.pad(up_t, ((0, 0), (0, 0), (0, F_pad - F)))
        down_t = jnp.pad(down_t, ((0, 0), (0, F_pad - F), (0, 0)))
    # Fuse gate+up, interleaved per TF tile: block f = [gate_f | up_f].
    guw = jnp.concatenate(
        [gate_t.reshape(E, H, nf, TF), up_t.reshape(E, H, nf, TF)],
        axis=-1).reshape(E, H, 2 * F_pad)

    # ---- grouped (sorted-by-expert) routing metadata -------------------------
    flat_ids = topk_ids.reshape(A)
    flat_tok = jnp.arange(A, dtype=jnp.int32) // K
    flat_w = topk_weights.reshape(A)
    order = jnp.argsort(flat_ids)
    sorted_tok = flat_tok[order]
    sorted_w = flat_w[order]

    counts = jnp.bincount(flat_ids, length=E).astype(jnp.int32)    # (E,)
    group_start = jnp.cumsum(counts) - counts
    blocks_per_e = (counts + TT - 1) // TT
    cum_blocks = jnp.cumsum(blocks_per_e)
    block_start_e = cum_blocks - blocks_per_e
    num_blocks = cum_blocks[-1]                                     # dynamic

    max_blocks = (A + TT - 1) // TT + min(E, A)                     # static bound
    P = max_blocks * TT

    bids = jnp.arange(max_blocks, dtype=jnp.int32)
    blk_expert_raw = jnp.searchsorted(cum_blocks, bids, side='right')
    # Trailing unused blocks repeat the last real block's expert so most of
    # their weight DMAs are elided; their rows carry weight 0 (harmless).
    last_valid = jnp.maximum(num_blocks - 1, 0)
    blk_expert = blk_expert_raw[jnp.minimum(bids, last_valid)]
    blk_expert = jnp.clip(blk_expert, 0, E - 1).astype(jnp.int32)

    rows = jnp.arange(P, dtype=jnp.int32)
    rb = rows // TT
    rr = rows % TT
    re = blk_expert[rb]
    local = (rb - block_start_e[re]) * TT + rr
    valid = local < counts[re]
    src = group_start[re] + jnp.where(valid, local, 0)
    padded_tok = jnp.where(valid, sorted_tok[src], 0)               # (P,)
    padded_w = jnp.where(valid, sorted_w[src], 0.0).reshape(P, 1)   # (P, 1) f32
    x_rows = jnp.take(hidden_states, padded_tok, axis=0)            # (P, H)

    grid = (max_blocks, nf)
    flops = 6 * P * H * F_pad
    bytes_accessed = int(P * H * x_isz
                         + max_blocks * 3 * H * F_pad * w_isz       # re-streamed per block
                         + P * H * o_isz + P * 4 + max_blocks * 4)
    cost = pl.CostEstimate(flops=flops, transcendentals=P * F_pad,
                           bytes_accessed=bytes_accessed)

    out_rows = pl.pallas_call(
        _grouped_moe_kernel,
        out_shape=jax.ShapeDtypeStruct((P, H), out_dtype),
        grid_spec=pltpu.PrefetchScalarGridSpec(
            num_scalar_prefetch=1,             # block_expert -> SMEM
            grid=grid,
            in_specs=[
                pl.BlockSpec((TT, 1), lambda b, f, be: (b, 0)),      # router weights
                pl.BlockSpec((TT, H), lambda b, f, be: (b, 0)),      # gathered tokens
                pl.BlockSpec((pl.Squeezed(), H, 2 * TF),
                             lambda b, f, be: (be[b], 0, f)),        # fused gate|up
                pl.BlockSpec((pl.Squeezed(), TF, H),
                             lambda b, f, be: (be[b], f, 0)),        # down proj
            ],
            out_specs=pl.BlockSpec((TT, H), lambda b, f, be: (b, 0)),
            scratch_shapes=[pltpu.VMEM((TT, H), jnp.float32)],       # f32 accumulator
        ),
        compiler_params=pltpu.CompilerParams(
            dimension_semantics=("parallel", "arbitrary"),
            vmem_limit_bytes=vmem_limit,
        ),
        cost_estimate=cost,
    )(blk_expert, padded_w, x_rows, guw, down_t)

    # Un-sort / combine the K expert contributions per token (padding rows are
    # exact zeros, scattered to token 0 -> no effect).
    out = jnp.zeros((T, H), jnp.float32).at[padded_tok].add(
        out_rows.astype(jnp.float32))
    return out.astype(out_dtype)


# ----------------------------------------------------------------------------
# Pure-JAX reference + self-test
# ----------------------------------------------------------------------------
def _reference_moe(x, tw, ids, gu, dn):
    """Pure-JAX f32 reference for correctness check."""
    F = gu.shape[1] // 2
    E = gu.shape[0]
    x = x.astype(jnp.float32)
    out = jnp.zeros((x.shape[0], x.shape[1]), jnp.float32)
    for e in range(E):
        h = x @ gu[e].astype(jnp.float32).T
        act = jax.nn.silu(h[:, :F]) * h[:, F:]
        oe = act @ dn[e].astype(jnp.float32).T
        w = jnp.sum(jnp.where(ids == e, tw, 0.0), axis=1, keepdims=True)
        out = out + w * oe
    return out


if __name__ == "__main__":
    # Small, TPU-tile-friendly shapes.
    T = 8          # tokens
    H = 128        # hidden_dim
    F = 256        # ffn_dim
    E = 4          # num_experts
    K = 2          # top_k

    key = jax.random.PRNGKey(0)
    kx, kg, kd, kr = jax.random.split(key, 4)

    hidden_states = jax.random.normal(kx, (T, H), dtype=jnp.float32)
    gate_up_weights = jax.random.normal(kg, (E, 2 * F, H), dtype=jnp.float32) * 0.05
    down_weights = jax.random.normal(kd, (E, H, F), dtype=jnp.float32) * 0.05

    # Router outputs: top-k over a random gating logit matrix.
    logits = jax.random.normal(kr, (T, E), dtype=jnp.float32)
    topk_weights, topk_ids = jax.lax.top_k(jax.nn.softmax(logits, axis=-1), K)
    topk_ids = topk_ids.astype(jnp.int32)

    ref = _reference_moe(hidden_states, topk_weights, topk_ids,
                         gate_up_weights, down_weights)

    # f32 path: tight check.
    out = fused_moe(hidden_states, topk_weights, topk_ids,
                    gate_up_weights, down_weights, renormalize=False)
    out = jax.block_until_ready(out)
    assert jnp.allclose(out, ref, atol=1e-4, rtol=1e-4), "f32 mismatch vs reference"

    # bf16 path (production dtype): bf16 operands on the MXU, f32 accumulation.
    out_bf16 = fused_moe(hidden_states.astype(jnp.bfloat16),
                         topk_weights, topk_ids,
                         gate_up_weights.astype(jnp.bfloat16),
                         down_weights.astype(jnp.bfloat16),
                         renormalize=False)
    out_bf16 = jax.block_until_ready(out_bf16)
    assert jnp.allclose(out_bf16.astype(jnp.float32), ref,
                        atol=5e-2, rtol=5e-2), "bf16 mismatch vs f32 reference"

    print("KERNEL_OK")
</pallas_src>

<mosaic_0001>
module attributes {stable_mosaic.version = 11 : i64} {
  func.func @_grouped_moe_kernel(%arg0: i32, %arg1: i32, %arg2: memref<6xi32, #tpu.memory_space<smem>>, %arg3: memref<8x1xf32, #tpu.memory_space<vmem>>, %arg4: memref<8x128xf32, #tpu.memory_space<vmem>>, %arg5: memref<1x128x512xf32, #tpu.memory_space<vmem>>, %arg6: memref<1x256x128xf32, #tpu.memory_space<vmem>>, %arg7: memref<8x128xf32, #tpu.memory_space<vmem>>, %arg8: memref<8x128xf32, #tpu.memory_space<vmem>>) attributes {dimension_semantics = [#tpu.dimension_semantics<parallel>, #tpu.dimension_semantics<arbitrary>], iteration_bounds = array<i64: 6, 1>, scalar_prefetch = 1 : i64, scratch_operands = 1 : i64, tpu.core_type = #tpu.core_type<tc>, window_params = [{transform_indices = @transform_0, window_bounds = array<i64: 8, 1>}, {transform_indices = @transform_1, window_bounds = array<i64: 8, 128>}, {transform_indices = @transform_2, window_bounds = array<i64: 1, 128, 512>}, {transform_indices = @transform_3, window_bounds = array<i64: 1, 256, 128>}, {transform_indices = @transform_4, window_bounds = array<i64: 8, 128>}]} {
    %c0_i32 = arith.constant 0 : i32
    %0 = arith.cmpi eq, %arg1, %c0_i32 : i32
    %1 = arith.extui %0 : i1 to i32
    %c0_i32_0 = arith.constant 0 : i32
    %2 = arith.cmpi ne, %1, %c0_i32_0 : i32
    scf.if %2 {
      %cst_16 = arith.constant 0.000000e+00 : f32
      %25 = vector.broadcast %cst_16 : f32 to vector<8x128xf32>
      %c0_17 = arith.constant 0 : index
      %c0_18 = arith.constant 0 : index
      %26 = vector.load %arg8[%c0_17, %c0_18] : memref<8x128xf32, #tpu.memory_space<vmem>>, vector<8x128xf32>
      tpu.vector_store %arg8[%c0_17, %c0_18], %25 {strides = array<i32>} : memref<8x128xf32, #tpu.memory_space<vmem>>, vector<8x128xf32>,
    } else {
    }
    %c0 = arith.constant 0 : index
    %c0_1 = arith.constant 0 : index
    %3 = vector.load %arg4[%c0, %c0_1] : memref<8x128xf32, #tpu.memory_space<vmem>>, vector<8x128xf32>
    %c0_2 = arith.constant 0 : index
    %c0_3 = arith.constant 0 : index
    %c0_4 = arith.constant 0 : index
    %4 = vector.load %arg5[%c0_2, %c0_3, %c0_4] : memref<1x128x512xf32, #tpu.memory_space<vmem>>, vector<1x128x512xf32>
    %5 = vector.shape_cast %4 : vector<1x128x512xf32> to vector<128x512xf32>
    %cst = arith.constant dense<0.000000e+00> : vector<8x512xf32>
    %6 = tpu.matmul %3, %5, %cst {dimension_numbers = #tpu.dot_dimension_numbers<[1], [0], [0], [1], [0, 0, 1, 1], [], []>} : vector<8x128xf32>, vector<128x512xf32>, vector<8x512xf32> -> vector<8x512xf32>
    %7 = vector.extract_strided_slice %6 {offsets = [0, 0], sizes = [8, 256], strides = [1, 1]} : vector<8x512xf32> to vector<8x256xf32>
    %8 = vector.extract_strided_slice %6 {offsets = [0, 256], sizes = [8, 256], strides = [1, 1]} : vector<8x512xf32> to vector<8x256xf32>
    %9 = arith.negf %7 : vector<8x256xf32>
    %10 = math.exp %9 : vector<8x256xf32>
    %cst_5 = arith.constant 1.000000e+00 : f32
    %11 = vector.broadcast %cst_5 : f32 to vector<8x256xf32>
    %12 = arith.addf %11, %10 : vector<8x256xf32>
    %13 = arith.divf %11, %12 : vector<8x256xf32>
    %14 = arith.mulf %7, %13 : vector<8x256xf32>
    %15 = arith.mulf %14, %8 : vector<8x256xf32>
    %c0_6 = arith.constant 0 : index
    %c0_7 = arith.constant 0 : index
    %16 = vector.load %arg8[%c0_6, %c0_7] : memref<8x128xf32, #tpu.memory_space<vmem>>, vector<8x128xf32>
    %c0_8 = arith.constant 0 : index
    %c0_9 = arith.constant 0 : index
    %c0_10 = arith.constant 0 : index
    %17 = vector.load %arg6[%c0_8, %c0_9, %c0_10] : memref<1x256x128xf32, #tpu.memory_space<vmem>>, vector<1x256x128xf32>
    %18 = vector.shape_cast %17 : vector<1x256x128xf32> to vector<256x128xf32>
    %cst_11 = arith.constant dense<0.000000e+00> : vector<8x128xf32>
    %19 = tpu.matmul %15, %18, %cst_11 {dimension_numbers = #tpu.dot_dimension_numbers<[1], [0], [0], [1], [0, 0, 1, 1], [], []>} : vector<8x256xf32>, vector<256x128xf32>, vector<8x128xf32> -> vector<8x128xf32>
    %20 = arith.addf %16, %19 : vector<8x128xf32>
    %c0_12 = arith.constant 0 : index
    %c0_13 = arith.constant 0 : index
    %21 = vector.load %arg8[%c0_12, %c0_13] : memref<8x128xf32, #tpu.memory_space<vmem>>, vector<8x128xf32>
    tpu.vector_store %arg8[%c0_12, %c0_13], %20 {strides = array<i32>} : memref<8x128xf32, #tpu.memory_space<vmem>>, vector<8x128xf32>,
    %c0_i32_14 = arith.constant 0 : i32
    %22 = arith.cmpi eq, %arg1, %c0_i32_14 : i32
    %23 = arith.extui %22 : i1 to i32
    %c0_i32_15 = arith.constant 0 : i32
    %24 = arith.cmpi ne, %23, %c0_i32_15 : i32
    scf.if %24 {
      %c0_16 = arith.constant 0 : index
      %c0_17 = arith.constant 0 : index
      %25 = vector.load %arg8[%c0_16, %c0_17] : memref<8x128xf32, #tpu.memory_space<vmem>>, vector<8x128xf32>
      %c0_18 = arith.constant 0 : index
      %c0_19 = arith.constant 0 : index
      %26 = vector.load %arg3[%c0_18, %c0_19] : memref<8x1xf32, #tpu.memory_space<vmem>>, vector<8x1xf32>
      %27 = vector.broadcast %26 : vector<8x1xf32> to vector<8x128xf32>
      %28 = arith.mulf %25, %27 : vector<8x128xf32>
      %c0_20 = arith.constant 0 : index
      %c0_21 = arith.constant 0 : index
      %29 = vector.load %arg7[%c0_20, %c0_21] : memref<8x128xf32, #tpu.memory_space<vmem>>, vector<8x128xf32>
      tpu.vector_store %arg7[%c0_20, %c0_21], %28 {strides = array<i32>} : memref<8x128xf32, #tpu.memory_space<vmem>>, vector<8x128xf32>,
    } else {
    }
    return
  }
  func.func @transform_0(%arg0: i32, %arg1: i32, %arg2: memref<6xi32, #tpu.memory_space<smem>>) -> (i32, i32) {
    %c0_i32 = arith.constant 0 : i32
    %c0_i32_0 = arith.constant 0 : i32
    return %arg0, %c0_i32 : i32, i32
  }
  func.func @transform_1(%arg0: i32, %arg1: i32, %arg2: memref<6xi32, #tpu.memory_space<smem>>) -> (i32, i32) {
    %c0_i32 = arith.constant 0 : i32
    %c0_i32_0 = arith.constant 0 : i32
    return %arg0, %c0_i32 : i32, i32
  }
  func.func @transform_2(%arg0: i32, %arg1: i32, %arg2: memref<6xi32, #tpu.memory_space<smem>>) -> (i32, i32, i32) {
    %0 = arith.index_cast %arg0 : i32 to index
    %1 = memref.load %arg2[%0] : memref<6xi32, #tpu.memory_space<smem>>
    %c0_i32 = arith.constant 0 : i32
    %c0_i32_0 = arith.constant 0 : i32
    return %1, %c0_i32, %arg1 : i32, i32, i32
  }
  func.func @transform_3(%arg0: i32, %arg1: i32, %arg2: memref<6xi32, #tpu.memory_space<smem>>) -> (i32, i32, i32) {
    %0 = arith.index_cast %arg0 : i32 to index
    %1 = memref.load %arg2[%0] : memref<6xi32, #tpu.memory_space<smem>>
    %c0_i32 = arith.constant 0 : i32
    %c0_i32_0 = arith.constant 0 : i32
    return %1, %arg1, %c0_i32 : i32, i32, i32
  }
  func.func @transform_4(%arg0: i32, %arg1: i32, %arg2: memref<6xi32, #tpu.memory_space<smem>>) -> (i32, i32) {
    %c0_i32 = arith.constant 0 : i32
    %c0_i32_0 = arith.constant 0 : i32
    return %arg0, %c0_i32 : i32, i32
  }
}

</mosaic_0001>

<bundles_post_ra>
// kernel: tpu_custom_call.1
= control target key start
LH: loop header
LB: loop body
LE: loop exit
PB: predicated region body
PF: predicated region fallthrough
CT: control target
= control target key end

     0   :  { %s1131_s21 = smov [#allocation4]   ;;  %s1550_s0 = inlined_call_operand.vmem [shape: s32[6], index: 0, kind: input, shape index: {}]   ;;  %s1551_s1 = inlined_call_operand.vmem [shape: f32[48,1], index: 1, kind: input, shape index: {}]   ;;  %s1552_s2 = inlined_call_operand.vmem [shape: f32[48,128], index: 2, kind: input, shape index: {}]   ;;  %s1553_s3 = inlined_call_operand.hbm [shape: f32[4,128,512], index: 3, kind: input, shape index: {}]   ;;  %s1554_s4 = inlined_call_operand.hbm [shape: f32[4,256,128], index: 4, kind: input, shape index: {}]   ;;  %s1555_s5 = inlined_call_operand.hbm [shape: f32[48,128], index: 5, kind: output, shape index: {}]  }
   0x1   :  { %1567 = sst [smem:[#allocation28_spill]] %s1555_s5  ;;  %s11_s20 = sshll.u32 %s1550_s0, 4  ;;  %s12_s20 = int_to_ptr.vmem [resolvable:$true] %s11_s20 }
   0x2   :  { %14 = dma.vmem_to_smem %s12_s20, 16, %s1131_s21, [#allocation3] }
   0x3   :  { %1069 = dma.done.wait [#allocation3], 16 }
   0x4   :  { %1070 = vsyncadd [#allocation3], 4294967280 }
   0x5   :  { %17 = sfence }
   0x6   :  { %18 = vsyncpa [#allocation6], 0 }
   0x7   :  { %20 = vsyncpa [#allocation6 + $0x1], 0 }
   0x8   :  { %21 = vsyncpa [#allocation9], 0 }
   0x9   :  { %23 = vsyncpa [#allocation9 + $0x1], 0 }
   0xa   :  { %24 = vsyncpa [#allocation7], 0 }
   0xb   :  { %26 = vsyncpa [#allocation7 + $0x1], 0  ;;  %s1170_s22 = smov 0   ;;  %s1172_s23 = smov 0  }
   0xc   :  { %s1174_s24 = smov 0   ;;  %s1176_s25 = smov 0  }
   0xd   :  { %s1178_s0 = smov 0   ;;  %s1180_s26 = smov 0  }
   0xe   :  { %s1182_s27 = smov 0   ;;  %s1184_s28 = smov 0  }
   0xf   :  { %s1186_s29 = smov 0   ;;  %s1188_s30 = smov 0  }
  0x10   :  { %s1190_s6 = smov 0   ;;  %s1192_s7 = smov 0  }
  0x11 LB: > { %1568 = sst [smem:[#allocation19_spill]] %s1085_s22  ;;  %s759_s8 = sadd.s32 4294967295, %s1129_s7   ;;  %s1129_s7 = sphi %s1192_s7, %s32_s7   ;;  %s1125_s6 = sphi %s1190_s6, %s1609_s6   ;;  %s1121_s30 = sphi %s1188_s30, %s1608_s30   ;;  %s1117_s29 = sphi %s1186_s29, %s1602_s29   ;;  %s1113_s28 = sphi %s1184_s28, %s1607_s28   ;;  %s1109_s27 = sphi %s1182_s27, %s1606_s27   ;;  %s1105_s26 = sphi %s1180_s26, %s1605_s26   ;;  %s1101_s0 = sphi %s1178_s0, %s1604_s0   ;;  %s1097_s25 = sphi %s1176_s25, %s1603_s25   ;;  %s1093_s24 = sphi %s1174_s24, %s1600_s24   ;;  %s1089_s23 = sphi %s1172_s23, %s1599_s23   ;;  %s1085_s22 = sphi %s1170_s22, %s1598_s22  }
  0x12   : > { %1569 = sst [smem:[#allocation20_spill]] %s1089_s23  ;;  %s760_s9 = sadd.s32 4294967294, %s1129_s7  }
  0x13   : > { %1570 = sst [smem:[#allocation21_spill]] %s1093_s24  ;;  %s44_s10 = sadd.s32 1, %s1125_s6 }
  0x14   : > { %1571 = sst [smem:[#allocation22_spill]] %s1117_s29  ;;  %p46_p0 = scmp.ge.s32.totalorder %s44_s10, 6 }
  0x15   : > { %s100_s11 = sld [smem:[#allocation4 + %s1125_s6]]  ;;  %s107_s12 = sadd.s32 1, %s1117_s29 }
  0x16   : > { %p114_p1 = scmp.ne.s32.totalorder %s1117_s29, %s1113_s28  ;;  %p1566_p2 = scmp.eq.s32.totalorder %s1129_s7, 0 }
  0x17   : > { %s1611_s10 = smov (%p46_p0, %s44_s10), 0  ;;  %p120_p4 = scmp.ne.s32.totalorder %s1113_s28, %s1109_s27 }
  0x18   : > { %p1240_p3 = por %p1566_p2, %p114_p1  ;;  %s101_s14 = sld [smem:[#allocation4 + %s1611_s10]] }
  0x19   : > { %p1246_p5 = scmp.eq.s32.totalorder %s759_s8, 0  ;;  %s160_s16 = ssub.s32 %s1125_s6, %s1611_s10 }
  0x1a   : > { %s163_s17 = sadd.s32 1, %s1093_s24  ;;  %p161_p7 = scmp.eq.s32.totalorder %s160_s16, 0 }
  0x1b   : > { %p1255_p6 = por %p1246_p5, %p120_p4  ;;  %p173_p8 = scmp.ne.s32.totalorder %s1093_s24, %s1089_s23 }
  0x1c   : > { %p174_p9 = scmp.eq.s32.totalorder %s759_s8, 5  ;;  %p179_p11 = scmp.ne.s32.totalorder %s1089_s23, %s1085_s22 }
  0x1d   : > { %s1262_s19 = scalar_select %p161_p7, %s1093_s24, %s163_s17  }
  0x1e   : > { %p1264_p10 = por %p174_p9, %p173_p8  ;;  %s102_s21 = ssub.s32 %s100_s11, %s101_s14 }
  0x1f   : > { %1575 = sst [smem:[#allocation23_spill]] %s1262_s19  ;;  %p180_p12 = scmp.eq.s32.totalorder %s760_s9, 5 }
  0x20   : > { %s1576_s20 = scalar_select %p1264_p10, 1, 0 }
  0x21   : > { %p105_p13 = scmp.eq.s32.totalorder %s102_s21, 0  ;;  %p1270_p0 = por %p180_p12, %p179_p11 }
  0x22   : > { %1577 = sst [smem:[#allocation24_spill]] %s1576_s20  ;;  %p1565_p1 = scmp.lt.s32.totalorder %s1129_s7, 6 }
  0x23   : > { %s1578_s27 = scalar_select %p1270_p0, 1, 0 }
  0x24   : > { %s1276_s16 = scalar_select %p105_p13, %s1117_s29, %s107_s12  }
  0x25   : > { %1579 = sst [smem:[#allocation25_spill]] %s1578_s27  ;;  %s214_s8 = sand.u32 1, %s1117_s29  }
  0x26   : > { %1580 = sst [smem:[#allocation26_spill]] %s1276_s16  ;;  %p1283_p4 = pnand %p1565_p1, %p1240_p3 }
  0x27   : > { %s763_s9 = sshll.u32 %s214_s8, 9  ;;  %p769_p7 = scmp.ge.s32.totalorder %s1129_s7, 1 }
  0x28   : > { %s783_s11 = scalar_select %p1240_p3, [#allocation4], [#allocation11] }
  0x29   : > { %s784_s14 = scalar_select %p1240_p3, %s1125_s6, 0 }
  0x2a   : > { %s1613_s11 = smov (!%p1565_p1, %s783_s11), [#allocation13]  ;;  %s218_s12 = scalar_lea.vmem [#allocation5], %s763_s9 }
  0x2b   : > { %s1615_s14 = smov (!%p1565_p1, %s784_s14), 0  ;;  %s1296_s21 = sshll.u32 %s218_s12, 4 }
  0x2c   : > { %1582 = sst [smem:[#allocation27_spill]] %s1296_s21  ;;  %p262_p8 = scmp.lt.s32.totalorder %s1129_s7, 7 }
  0x2d   : > { %s219_s16 = sld [smem:[%s1613_s11 + %s1615_s14]]  ;;  %s215_s12 = scalar_lea.sflag [#allocation6], %s214_s8 }
  0x2e   : > { %p1301_p9 = pnand %p769_p7, %p262_p8  ;;  %s130_s19 = sld [smem:[#allocation4 + %s1125_s6]] }
  0x2f   : > { %s131_s20 = sld [smem:[#allocation4 + %s1611_s10]]  ;;  %p937_p12 = pneg %p1283_p4 }
  0x30   : > { %s940_s5 = scalar_lea.hbm %s1553_s3, 2048 }
  0x33   : > { %s781_s13 = sshll.u32 %s219_s16, 9 }
  0x34   : > { %s226_s22 = scalar_lea.hbm %s1553_s3, %s781_s13 }
  0x35   : > { %s227_s9 = sshll.u32 %s226_s22, 4  ;;  %s228_s9 = int_to_ptr.hbm [resolvable:$true] %s227_s9 }
  0x36   : > { %s933_s11 = sshra.s32 %s228_s9, 4  ;;  %s934_s11 = int_to_ptr.hbm [resolvable:$true] %s933_s11 }
  0x37   : > { %s935_s14 = scalar_lea.hbm %s934_s11, 512  ;;  %p941_p8 = scmp.lt.s32.totalorder %s934_s11, %s1553_s3 }
  0x38   : > { %p936_p11 = scmp.ne.s32.totalorder %s934_s11, %s935_s14  ;;  %p942_p1 = scmp.lt.s32.totalorder %s940_s5, %s935_s14 }
  0x3a   : > { %p938_p13 = pnand %p937_p12, %p936_p11  ;;  %p943_p2 = por %p942_p1, %p941_p8 }
  0x3c   : > { %p939_p7 = pneg %p938_p13 }
  0x3e   : > { %p944_p3 = pnand %p943_p2, %p939_p7 }
  0x40   : > { %947 = shalt.err (!%p944_p3)
}
  0x41   : > { %s1132_s22 = smov 512   ;;  %s1584_s27 = sld [smem:[#allocation27_spill]] }
  0x42   : > { %s1133_s5 = smov 32   ;;  %p150_p2 = scmp.ne.s32.totalorder %s1101_s0, %s1097_s25 }
  0x43   : > { %s137_s8 = sadd.s32 1, %s1105_s26  ;;  %p1586_p1 = scmp.eq.s32.totalorder %s1129_s7, 0 }
  0x44   : > { %p1587_p3 = scmp.ne.s32.totalorder %s1105_s26, %s1101_s0  ;;  %s132_s21 = ssub.s32 %s130_s19, %s131_s20 }
  0x45   : > { %p1334_p12 = por %p150_p2, %p1246_p5  ;;  %p135_p13 = scmp.eq.s32.totalorder %s132_s21, 0 }
  0x46   : > { %p146_p11 = por %p1587_p3, %p1586_p1  ;;  %s239_s11 = sand.u32 1, %s1105_s26  }
  0x47   : > { %s1585_s23 = int_to_ptr.vmem [resolvable:$true] %s1584_s27  ;;  %p1589_p7 = scmp.lt.s32.totalorder %s1129_s7, 6 }
  0x48   : > { %798 = dma.hbm_to_vmem [thread:$0]  (!%p1283_p4), %s228_s9, 8192, %s1585_s23, %s215_s12, %s1132_s22, %s1132_s22, %s1133_s5  }
  0x49   : > { %p1341_p8 = pnand %p1589_p7, %p146_p11  ;;  %s766_s25 = sshll.u32 %s239_s11, 8 }
  0x4a   : > { %s1346_s17 = scalar_select %p135_p13, %s1105_s26, %s137_s8  }
  0x4b   : > { %s786_s9 = scalar_select %p146_p11, [#allocation4], [#allocation12] }
  0x4c   : > { %s787_s12 = scalar_select %p146_p11, %s1125_s6, 0 }
  0x4d   : > { %p1591_p4 = pmov %p1589_p7  ;;  %s243_s19 = scalar_lea.vmem [#allocation8], %s766_s25 }
  0x4e   : > { %s254_s20 = sshll.u32 %s243_s19, 4  ;;  %s240_s23 = scalar_lea.sflag [#allocation9], %s239_s11  ;;  %s255_s20 = int_to_ptr.vmem [resolvable:$true] %s254_s20 }
  0x4f   : > { %s1617_s9 = smov (!%p1591_p4, %s786_s9), [#allocation14]  ;;  %p1592_p1 = pmov %p1591_p4 }
  0x50   : > { %p967_p2 = pneg %p1341_p8 }
  0x51   : > { %s1619_s12 = smov (!%p1592_p1, %s787_s12), 0 }
  0x52   : > { %s244_s15 = sld [smem:[%s1617_s9 + %s1619_s12]]  ;;  %s970_s12 = scalar_lea.hbm %s1554_s4, 1024 }
  0x58   : > { %s782_s16 = sshll.u32 %s244_s15, 8 }
  0x59   : > { %s251_s27 = scalar_lea.hbm %s1554_s4, %s782_s16 }
  0x5a   : > { %s252_s5 = sshll.u32 %s251_s27, 4  ;;  %s253_s5 = int_to_ptr.hbm [resolvable:$true] %s252_s5 }
  0x5b   : > { %s963_s8 = sshra.s32 %s253_s5, 4  ;;  %s964_s8 = int_to_ptr.hbm [resolvable:$true] %s963_s8 }
  0x5c   : > { %s965_s21 = scalar_lea.hbm %s964_s8, 256  ;;  %p971_p13 = scmp.lt.s32.totalorder %s964_s8, %s1554_s4 }
  0x5d   : > { %p966_p5 = scmp.ne.s32.totalorder %s964_s8, %s965_s21  ;;  %p972_p7 = scmp.lt.s32.totalorder %s970_s12, %s965_s21 }
  0x5f   : > { %p968_p3 = pnand %p967_p2, %p966_p5  ;;  %p973_p4 = por %p972_p7, %p971_p13 }
  0x61   : > { %p969_p11 = pneg %p968_p3 }
  0x63   : > { %p974_p1 = pnand %p973_p4, %p969_p11 }
  0x65   : > { %977 = shalt.err (!%p974_p1)
}
  0x66   : > { %s1134_s11 = smov 128   ;;  %s1135_s16 = smov 8  }
  0x67   : > { %803 = dma.hbm_to_vmem [thread:$0]  (!%p1341_p8), %s253_s5, 4096, %s255_s20, %s240_s23, %s1134_s11, %s1134_s11, %s1135_s16  }
  0x68   : > { %266 = sbr.rel (%p1301_p9) target bundleno = 438 (0x1b6), region = 36  ;;  %s268_s24 = sand.u32 (!%p1301_p9), 1, %s1113_s28  }
  0x69   : > { %s770_s22 = sshll.u32 (!%p1301_p9), %s268_s24, 9  ;;  %s269_s27 = scalar_lea.sflag (!%p1301_p9), [#allocation6], %s268_s24 }
  0x6a   : > { %s1369_s9 = scalar_lea.vmem (!%p1301_p9), [#allocation5], %s770_s22 }
  0x6d   : > { %1072 = dma.done.wait (%p1255_p6), %s269_s27, 8192  }
  0x6e   : > { %1074 = vsyncadd (%p1255_p6), %s269_s27, 4294959104  ;;  %s278_s8 = sand.u32 1, %s1101_s0  }
  0x6f   : > { %s771_s14 = sshll.u32 %s278_s8, 8  ;;  %s279_s20 = scalar_lea.sflag [#allocation9], %s278_s8 }
  0x70   : > { %s1376_s5 = scalar_lea.vmem [#allocation8], %s771_s14 }
  0x71   : > { %1076 = dma.done.wait (%p1334_p12), %s279_s20, 4096  }
  0x72   : > { %1078 = vsyncadd (%p1334_p12), %s279_s20, 4294963200  ;;  %v399_v0 = vld [vmem:[%s1369_s9 + $0x1e0] sm:$0xff]  ;;  %v400_v1 = vld [vmem:[%s1369_s9 + $0x1e8] sm:$0xff]  ;;  %p321_p6 = scmp.lt.s32.totalorder %s1121_s30, 5  ;;  %s1593_s19 = sld [smem:[#allocation20_spill]] }
  0x73   : > { %v395_v2 = vld [vmem:[%s1369_s9 + $0x1c0] sm:$0xff]  ;;  %403 = vmatpush.msra.mxu0 %v399_v0  ;;  %423 = vmatpush.msra.mxu1 %v400_v1  ;;  %v396_v3 = vld [vmem:[%s1369_s9 + $0x1c8] sm:$0xff]  ;;  %v401_v12 = vld [vmem:[%s1369_s9 + $0x1f0] sm:$0xff]  ;;  %s778_s24 = sshll.u32 %s1121_s30, 3 }
  0x74   : > { %v391_v4 = vld [vmem:[%s1369_s9 + $0x1a0] sm:$0xff]  ;;  %v392_v5 = vld [vmem:[%s1369_s9 + $0x1a8] sm:$0xff]  ;;  %v402_v14 = vld [vmem:[%s1369_s9 + $0x1f8] sm:$0xff]  ;;  %443 = vmatpush.msra.mxu2 %v401_v12  ;;  %s1420_s29 = scalar_select %p321_p6, %s1121_s30, 5 }
  0x75   : > { %404 = vmatpush.msra.mxu0 %v395_v2  ;;  %424 = vmatpush.msra.mxu1 %v396_v3  ;;  %v387_v6 = vld [vmem:[%s1369_s9 + $0x180] sm:$0xff]  ;;  %v388_v7 = vld [vmem:[%s1369_s9 + $0x188] sm:$0xff]  ;;  %v397_v16 = vld [vmem:[%s1369_s9 + $0x1d0] sm:$0xff] }
  0x76   : > { %v383_v8 = vld [vmem:[%s1369_s9 + $0x160] sm:$0xff]  ;;  %v384_v9 = vld [vmem:[%s1369_s9 + $0x168] sm:$0xff]  ;;  %463 = vmatpush.msra.mxu3 %v402_v14  ;;  %v398_v17 = vld [vmem:[%s1369_s9 + $0x1d8] sm:$0xff]  ;;  %444 = vmatpush.msra.mxu2 %v397_v16  ;;  %s773_s18 = sshll.u32 %s1420_s29, 3 }
  0x77   : > { %405 = vmatpush.msra.mxu0 %v391_v4  ;;  %425 = vmatpush.msra.mxu1 %v392_v5  ;;  %v379_v10 = vld [vmem:[%s1369_s9 + $0x140] sm:$0xff]  ;;  %v380_v11 = vld [vmem:[%s1369_s9 + $0x148] sm:$0xff]  ;;  %v393_v18 = vld [vmem:[%s1369_s9 + $0x1b0] sm:$0xff]  ;;  %s328_s21 = scalar_lea.vmem %s1552_s2, %s773_s18  ;;  %s324_s15 = scalar_lea.vmem %s1551_s1, %s773_s18 }
  0x78   : > { %v375_v13 = vld [vmem:[%s1369_s9 + $0x120] sm:$0xff]  ;;  %v376_v15 = vld [vmem:[%s1369_s9 + $0x128] sm:$0xff]  ;;  %v394_v19 = vld [vmem:[%s1369_s9 + $0x1b8] sm:$0xff]  ;;  %464 = vmatpush.msra.mxu3 %v398_v17  ;;  %445 = vmatpush.msra.mxu2 %v393_v18  ;;  %s318_s11 = sand.u32 1, %s1593_s19  }
  0x79   : > { %406 = vmatpush.msra.mxu0 %v387_v6  ;;  %426 = vmatpush.msra.mxu1 %v388_v7  ;;  %v371_v20 = vld [vmem:[%s1369_s9 + $0x100] sm:$0xff]  ;;  %v372_v21 = vld [vmem:[%s1369_s9 + $0x108] sm:$0xff]  ;;  %v389_v22 = vld [vmem:[%s1369_s9 + $0x190] sm:$0xff]  ;;  %s772_s16 = sshll.u32 %s318_s11, 3  ;;  %s613_s18 = scalar_lea.sflag [#allocation7], %s318_s11 }
  0x7a   : > { %v390_v23 = vld [vmem:[%s1369_s9 + $0x198] sm:$0xff]  ;;  %v367_v24 = vld [vmem:[%s1369_s9 + $0xe0] sm:$0xff]  ;;  %v368_v25 = vld [vmem:[%s1369_s9 + $0xe8] sm:$0xff]  ;;  %465 = vmatpush.msra.mxu3 %v394_v19  ;;  %446 = vmatpush.msra.mxu2 %v389_v22  ;;  %s320_s20 = scalar_lea.vmem [#allocation10], %s772_s16 }
  0x7b   : > { %407 = vmatpush.msra.mxu0 %v383_v8  ;;  %427 = vmatpush.msra.mxu1 %v384_v9  ;;  %v385_v26 = vld [vmem:[%s1369_s9 + $0x170] sm:$0xff]  ;;  %v386_v27 = vld [vmem:[%s1369_s9 + $0x178] sm:$0xff]  ;;  %v363_v28 = vld [vmem:[%s1369_s9 + $0xc0] sm:$0xff] }
  0x7c   : > { %v364_v29 = vld [vmem:[%s1369_s9 + $0xc8] sm:$0xff]  ;;  %466 = vmatpush.msra.mxu3 %v390_v23  ;;  %v381_v30 = vld [vmem:[%s1369_s9 + $0x150] sm:$0xff]  ;;  %v382_v31 = vld [vmem:[%s1369_s9 + $0x158] sm:$0xff]  ;;  %447 = vmatpush.msra.mxu2 %v385_v26 }
  0x7d   : > { %408 = vmatpush.msra.mxu0 %v379_v10  ;;  %428 = vmatpush.msra.mxu1 %v380_v11  ;;  %v359_v32 = vld [vmem:[%s1369_s9 + $0xa0] sm:$0xff]  ;;  %v360_v33 = vld [vmem:[%s1369_s9 + $0xa8] sm:$0xff]  ;;  %v377_v34 = vld [vmem:[%s1369_s9 + $0x130] sm:$0xff] }
  0x7e   : > { %467 = vmatpush.msra.mxu3 %v386_v27  ;;  %v378_v35 = vld [vmem:[%s1369_s9 + $0x138] sm:$0xff]  ;;  %v355_v36 = vld [vmem:[%s1369_s9 + $0x80] sm:$0xff]  ;;  %v356_v37 = vld [vmem:[%s1369_s9 + $0x88] sm:$0xff]  ;;  %448 = vmatpush.msra.mxu2 %v381_v30 }
  0x7f   : > { %409 = vmatpush.msra.mxu0 %v375_v13  ;;  %429 = vmatpush.msra.mxu1 %v376_v15  ;;  %v373_v38 = vld [vmem:[%s1369_s9 + $0x110] sm:$0xff]  ;;  %v374_v39 = vld [vmem:[%s1369_s9 + $0x118] sm:$0xff]  ;;  %v351_v40 = vld [vmem:[%s1369_s9 + $0x60] sm:$0xff] }
  0x80   : > { %468 = vmatpush.msra.mxu3 %v382_v31  ;;  %v352_v41 = vld [vmem:[%s1369_s9 + $0x68] sm:$0xff]  ;;  %449 = vmatpush.msra.mxu2 %v377_v34  ;;  %v369_v42 = vld [vmem:[%s1369_s9 + $0xf0] sm:$0xff]  ;;  %v370_v43 = vld [vmem:[%s1369_s9 + $0xf8] sm:$0xff] }
  0x81   : > { %410 = vmatpush.msra.mxu0 %v371_v20  ;;  %430 = vmatpush.msra.mxu1 %v372_v21  ;;  %v347_v44 = vld [vmem:[%s1369_s9 + $0x40] sm:$0xff]  ;;  %v348_v45 = vld [vmem:[%s1369_s9 + $0x48] sm:$0xff]  ;;  %v365_v46 = vld [vmem:[%s1369_s9 + $0xd0] sm:$0xff] }
  0x82   : > { %469 = vmatpush.msra.mxu3 %v378_v35  ;;  %450 = vmatpush.msra.mxu2 %v373_v38  ;;  %v366_v47 = vld [vmem:[%s1369_s9 + $0xd8] sm:$0xff]  ;;  %v343_v48 = vld [vmem:[%s1369_s9 + $0x20] sm:$0xff]  ;;  %v344_v49 = vld [vmem:[%s1369_s9 + $0x28] sm:$0xff]  ;;  %v1136_v38 = vmov 0  }
  0x83   : > { %411 = vmatpush.msra.mxu0 %v367_v24  ;;  %431 = vmatpush.msra.mxu1 %v368_v25  ;;  %v361_v50 = vld [vmem:[%s1369_s9 + $0xb0] sm:$0xff]  ;;  %v362_v51 = vld [vmem:[%s1369_s9 + $0xb8] sm:$0xff]  ;;  %v339_v52 = vld [vmem:[%s1369_s9] sm:$0xff] }
  0x84   : > { %470 = vmatpush.msra.mxu3 %v374_v39  ;;  %451 = vmatpush.msra.mxu2 %v369_v42  ;;  %v340_v53 = vld [vmem:[%s1369_s9 + $0x8] sm:$0xff]  ;;  %v338_v54 = vld [vmem:[%s328_s21] sm:$0xff]  ;;  %v357_v55 = vld [vmem:[%s1369_s9 + $0x90] sm:$0xff] }
  0x85   : > { %412 = vmatpush.msra.mxu0 %v363_v28  ;;  %432 = vmatpush.msra.mxu1 %v364_v29  ;;  %v358_v56 = vld [vmem:[%s1369_s9 + $0x98] sm:$0xff]  ;;  %v353_v57 = vld [vmem:[%s1369_s9 + $0x70] sm:$0xff]  ;;  %v539_v5 = vld [vmem:[%s1376_s5 + $0x68] sm:$0xff] }
  0x86   : > { %471 = vmatpush.msra.mxu3 %v370_v43  ;;  %452 = vmatpush.msra.mxu2 %v365_v46  ;;  %v354_v58 = vld [vmem:[%s1369_s9 + $0x78] sm:$0xff]  ;;  %v349_v59 = vld [vmem:[%s1369_s9 + $0x50] sm:$0xff]  ;;  %v555_v6 = vld [vmem:[%s1376_s5 + $0xe8] sm:$0xff] }
  0x87   : > { %413 = vmatpush.msra.mxu0 %v359_v32  ;;  %433 = vmatpush.msra.mxu1 %v360_v33  ;;  %v350_v60 = vld [vmem:[%s1369_s9 + $0x58] sm:$0xff]  ;;  %v345_v61 = vld [vmem:[%s1369_s9 + $0x30] sm:$0xff]  ;;  %v538_v7 = vld [vmem:[%s1376_s5 + $0x60] sm:$0xff] }
  0x88   : > { %472 = vmatpush.msra.mxu3 %v366_v47  ;;  %453 = vmatpush.msra.mxu2 %v361_v50  ;;  %v346_v62 = vld [vmem:[%s1369_s9 + $0x38] sm:$0xff]  ;;  %v341_v63 = vld [vmem:[%s1369_s9 + $0x10] sm:$0xff]  ;;  %v554_v8 = vld [vmem:[%s1376_s5 + $0xe0] sm:$0xff] }
  0x89   : > { %414 = vmatpush.msra.mxu0 %v355_v36  ;;  %434 = vmatpush.msra.mxu1 %v356_v37  ;;  %v342_v0 = vld [vmem:[%s1369_s9 + $0x18] sm:$0xff]  ;;  %v540_v3 = vld [vmem:[%s1376_s5 + $0x70] sm:$0xff]  ;;  %v535_v13 = vld [vmem:[%s1376_s5 + $0x48] sm:$0xff]  ;;  %s1594_s9 = sld [smem:[#allocation28_spill]] }
  0x8a   : > { %473 = vmatpush.msra.mxu3 %v362_v51  ;;  %454 = vmatpush.msra.mxu2 %v357_v55  ;;  %v541_v1 = vld [vmem:[%s1376_s5 + $0x78] sm:$0xff]  ;;  %v556_v4 = vld [vmem:[%s1376_s5 + $0xf0] sm:$0xff]  ;;  %v551_v14 = vld [vmem:[%s1376_s5 + $0xc8] sm:$0xff] }
  0x8b   : > { %415 = vmatpush.msra.mxu0 %v351_v40  ;;  %435 = vmatpush.msra.mxu1 %v352_v41  ;;  %v557_v2 = vld [vmem:[%s1376_s5 + $0xf8] sm:$0xff]  ;;  %v536_v11 = vld [vmem:[%s1376_s5 + $0x50] sm:$0xff]  ;;  %v534_v15 = vld [vmem:[%s1376_s5 + $0x40] sm:$0xff] }
  0x8c   : > { %474 = vmatpush.msra.mxu3 %v358_v56  ;;  %455 = vmatpush.msra.mxu2 %v353_v57  ;;  %v537_v9 = vld [vmem:[%s1376_s5 + $0x58] sm:$0xff]  ;;  %v552_v12 = vld [vmem:[%s1376_s5 + $0xd0] sm:$0xff]  ;;  %v550_v16 = vld [vmem:[%s1376_s5 + $0xc0] sm:$0xff] }
  0x8d   : > { %416 = vmatpush.msra.mxu0 %v347_v44  ;;  %436 = vmatpush.msra.mxu1 %v348_v45  ;;  %v553_v10 = vld [vmem:[%s1376_s5 + $0xd8] sm:$0xff]  ;;  %v532_v19 = vld [vmem:[%s1376_s5 + $0x30] sm:$0xff]  ;;  %v531_v21 = vld [vmem:[%s1376_s5 + $0x28] sm:$0xff] }
  0x8e   : > { %475 = vmatpush.msra.mxu3 %v354_v58  ;;  %456 = vmatpush.msra.mxu2 %v349_v59  ;;  %v533_v17 = vld [vmem:[%s1376_s5 + $0x38] sm:$0xff]  ;;  %v548_v20 = vld [vmem:[%s1376_s5 + $0xb0] sm:$0xff]  ;;  %v547_v22 = vld [vmem:[%s1376_s5 + $0xa8] sm:$0xff] }
  0x8f   : > { %417 = vmatpush.msra.mxu0 %v343_v48  ;;  %437 = vmatpush.msra.mxu1 %v344_v49  ;;  %v549_v18 = vld [vmem:[%s1376_s5 + $0xb8] sm:$0xff]  ;;  %v530_v23 = vld [vmem:[%s1376_s5 + $0x20] sm:$0xff]  ;;  %v528_v27 = vld [vmem:[%s1376_s5 + $0x10] sm:$0xff]  ;;  %s623_s8 = scalar_lea.hbm %s1594_s9, %s778_s24  ;;  %s1013_s25 = scalar_lea.hbm %s1594_s9, 48 }
  0x90   : > { %476 = vmatpush.msra.mxu3 %v350_v60  ;;  %457 = vmatpush.msra.mxu2 %v345_v61  ;;  %v546_v24 = vld [vmem:[%s1376_s5 + $0xa0] sm:$0xff]  ;;  %v529_v25 = vld [vmem:[%s1376_s5 + $0x18] sm:$0xff]  ;;  %v544_v28 = vld [vmem:[%s1376_s5 + $0x90] sm:$0xff]  ;;  %s627_s29 = sshll.u32 %s623_s8, 4  ;;  %s628_s29 = int_to_ptr.hbm [resolvable:$true] %s627_s29 }
  0x91   : > { %418 = vmatpush.msra.mxu0 %v339_v52  ;;  %438 = vmatpush.msra.mxu1 %v340_v53  ;;  %v545_v26 = vld [vmem:[%s1376_s5 + $0x98] sm:$0xff]  ;;  %v527_v29 = vld [vmem:[%s1376_s5 + $0x8] sm:$0xff]  ;;  %v526_v33 = vld [vmem:[%s1376_s5] sm:$0xff]  ;;  %s1007_s13 = sshra.s32 %s628_s29, 4  ;;  %s1008_s13 = int_to_ptr.hbm [resolvable:$true] %s1007_s13 }
  0x92   : > { %419 = vmatmul.f32.vlgmr.msra.gmra.mxu0 %v338_v54  ;;  %439 = vmatmul.f32.vlgmr.msra.gmra.mxu1 %v338_v54  ;;  %v543_v30 = vld [vmem:[%s1376_s5 + $0x88] sm:$0xff]  ;;  %v542_v34 = vld [vmem:[%s1376_s5 + $0x80] sm:$0xff]  ;;  %s625_s5 = sshll.u32 %s320_s20, 4  ;;  %s1009_s30 = scalar_lea.hbm %s1008_s13, 8  ;;  %s626_s5 = int_to_ptr.vmem [resolvable:$true] %s625_s5 }
  0x93   : > { %477 = vmatpush.msra.mxu3 %v346_v62  ;;  %458 = vmatpush.msra.mxu2 %v341_v63  ;;  %v604_v37 = vld [vmem:[%s324_s15] sm:$0xff]  ;;  %p1010_p9 = scmp.ne.s32.totalorder %s1008_s13, %s1009_s30  ;;  %p1014_p5 = scmp.lt.s32.totalorder %s1008_s13, %s1594_s9 }
  0x94   : > { %459 = vmatmul.f32.vlgmr.msra.gmra.mxu2 %v338_v54  ;;  %558 = vmatpush.msrb.mxu0 %v541_v1  ;;  %p1015_p2 = scmp.lt.s32.totalorder %s1013_s25, %s1009_s30 }
  0x95   : > { %478 = vmatpush.msra.mxu3 %v342_v0  ;;  %578 = vmatpush.msrb.mxu1 %v557_v2  ;;  %p1011_p12 = pnand %p1010_p9, %p1264_p10 }
  0x96   : > { %479 = vmatmul.f32.vlgmr.msra.gmra.mxu3 %v338_v54  ;;  %559 = vmatpush.msrb.mxu0 %v540_v3  ;;  %p1016_p3 = por %p1015_p2, %p1014_p5 }
  0x97   : > { %579 = vmatpush.msrb.mxu1 %v556_v4  ;;  %912 = vset.pattern.permute.xlu0 %v1136_v38  ;;  %p1012_p8 = pneg %p1011_p12 }
  0x98   : > { %560 = vmatpush.msrb.mxu0 %v539_v5  ;;  %607 = vperm.xlu0 %912, %v604_v37  }
  0x99   : > { %580 = vmatpush.msrb.mxu1 %v555_v6  ;;  %p1017_p11 = pnand %p1016_p3, %p1012_p8 }
  0x9a   : > { %561 = vmatpush.msrb.mxu0 %v538_v7 }
  0x9b   : > { %581 = vmatpush.msrb.mxu1 %v554_v8 }
  0x9c   : > { %562 = vmatpush.msrb.mxu0 %v537_v9 }
  0x9d   : > { %582 = vmatpush.msrb.mxu1 %v553_v10 }
  0x9e   : > { %563 = vmatpush.msrb.mxu0 %v536_v11 }
  0x9f   : > { %583 = vmatpush.msrb.mxu1 %v552_v12 }
  0xa0   : > { %564 = vmatpush.msrb.mxu0 %v535_v13 }
  0xa1   : > { %584 = vmatpush.msrb.mxu1 %v551_v14 }
  0xa2   : > { %565 = vmatpush.msrb.mxu0 %v534_v15 }
  0xa3   : > { %585 = vmatpush.msrb.mxu1 %v550_v16 }
  0xa4   : > { %566 = vmatpush.msrb.mxu0 %v533_v17 }
  0xa5   : > { %586 = vmatpush.msrb.mxu1 %v549_v18 }
  0xa6   : > { %567 = vmatpush.msrb.mxu0 %v532_v19 }
  0xa7   : > { %587 = vmatpush.msrb.mxu1 %v548_v20 }
  0xa8   : > { %568 = vmatpush.msrb.mxu0 %v531_v21 }
  0xa9   : > { %588 = vmatpush.msrb.mxu1 %v547_v22 }
  0xaa   : > { %569 = vmatpush.msrb.mxu0 %v530_v23 }
  0xab   : > { %589 = vmatpush.msrb.mxu1 %v546_v24 }
  0xac   : > { %570 = vmatpush.msrb.mxu0 %v529_v25 }
  0xad   : > { %590 = vmatpush.msrb.mxu1 %v545_v26 }
  0xae   : > { %571 = vmatpush.msrb.mxu0 %v528_v27 }
  0xaf   : > { %591 = vmatpush.msrb.mxu1 %v544_v28 }
  0xb0   : > { %572 = vmatpush.msrb.mxu0 %v527_v29 }
  0xb1   : > { %592 = vmatpush.msrb.mxu1 %v543_v30 }
  0xb2   : > { %573 = vmatpush.msrb.mxu0 %v526_v33 }
  0xb3   : > { %593 = vmatpush.msrb.mxu1 %v542_v34 }
 0x10a   : > { %v608_v7 = vpop.permute.xlu0 %607 }
 0x10f   : > { %v420_v31 = vpop.f32.mrf.mxu0  ;;  %v440_v32 = vpop.f32.mrf.mxu1 }
 0x110   : > { %v775_v35 = vmul.f32 -1.442695, %v420_v31  ;;  %v776_v36 = vmul.f32 -1.442695, %v440_v32 }
 0x112   : > { %913 = vpow2.f32 %v775_v35 }
 0x113   : > { %915 = vpow2.f32 %v776_v36 }
 0x117   : > { %v460_v62 = vpop.f32.mrf.mxu2 }
 0x118   : > { %v914_v39 = vpop.eup %913 }
 0x119   : > { %v916_v40 = vpop.eup %915  ;;  %v489_v41 = vadd.f32 1.0, %v914_v39  ;;  %v480_v1 = vpop.f32.mrf.mxu3 }
 0x11a   : > { %v490_v42 = vadd.f32 1.0, %v916_v40 }
 0x11b   : > { %917 = vrcp.f32 %v489_v41  ;;  %v502_v48 = vand.u32 2147483648, %v489_v41  ;;  %v500_v51 = vand.u32 2147483647, %v489_v41  ;;  %vm496_vm2 = vweird.f32 %v489_v41 }
 0x11c   : > { %919 = vrcp.f32 %v490_v42  ;;  %v517_v52 = vand.u32 2147483648, %v490_v42  ;;  %v515_v54 = vand.u32 2147483647, %v490_v42  ;;  %vm511_vm4 = vweird.f32 %v490_v42 }
 0x11d   : > { %v503_v56 = vor.u32 1.1754944e-38, %v502_v48  ;;  %vm501_vm5 = vcmp.eq.f32.partialorder %v500_v51, 8.507059e+37 }
 0x11e   : > { %v518_v59 = vor.u32 1.1754944e-38, %v517_v52  ;;  %vm516_vm7 = vcmp.eq.f32.partialorder %v515_v54, 8.507059e+37 }
 0x121   : > { %v918_v43 = vpop.eup %917 }
 0x122   : > { %v920_v44 = vpop.eup %919  ;;  %v492_v45 = vmul.f32 %v918_v43, %v489_v41  ;;  %vm497_vm0 = vweird.f32 %v918_v43 }
 0x123   : > { %v507_v46 = vmul.f32 %v920_v44, %v490_v42  ;;  %vm512_vm1 = vweird.f32 %v920_v44  ;;  %vm498_vm3 = vmor %vm496_vm2, %vm497_vm0 }
 0x124   : > { %v493_v47 = vsub.f32 1.0, %v492_v45  ;;  %vm513_vm6 = vmor %vm511_vm4, %vm512_vm1 }
 0x125   : > { %v508_v49 = vsub.f32 1.0, %v507_v46 }
 0x126   : > { %v494_v50 = vmul.f32 %v918_v43, %v493_v47 }
 0x127   : > { %v509_v53 = vmul.f32 %v920_v44, %v508_v49 }
 0x128   : > { %v495_v55 = vadd.f32 %v918_v43, %v494_v50 }
 0x129   : > { %v510_v57 = vadd.f32 %v920_v44, %v509_v53 }
 0x12a   : > { %v499_v58 = vsel %vm498_vm3, %v918_v43, %v495_v55 }
 0x12b   : > { %v504_v60 = vsel %vm501_vm5, %v503_v56, %v499_v58  ;;  %v514_v61 = vsel %vm513_vm6, %v920_v44, %v510_v57 }
 0x12c   : > { %v521_v63 = vmul.f32 %v504_v60, %v420_v31  ;;  %v519_v0 = vsel %vm516_vm7, %v518_v59, %v514_v61 }
 0x12d   : > { %v522_v2 = vmul.f32 %v519_v0, %v440_v32 }
 0x12e   : > { %v523_v3 = vmul.f32 %v521_v63, %v460_v62 }
 0x12f   : > { %v524_v4 = vmul.f32 %v522_v2, %v480_v1 }
 0x130   : > { %574 = vmatmul.f32.vlgmr.msrb.gmra.mxu0 %v523_v3 }
 0x131   : > { %594 = vmatmul.f32.vlgmr.msrb.gmra.mxu1 %v524_v4 }
 0x1ad   : > { %v575_v5 = vpop.f32.mrf.mxu0 }
 0x1ae   : > { %v595_v6 = vpop.f32.mrf.mxu1 }
 0x1af   : > { %v596_v8 = vadd.f32 %v595_v6, %v575_v5 }
 0x1b1   : > { %v610_v9 = vmul.f32 %v608_v7, %v596_v8 }
 0x1b3   : > { %611 = vst [vmem:[%s320_s20] sm:$0xff] %v610_v9 }
 0x1b4   : > { %1020 = shalt.err (!%p1017_p11)
}
 0x1b5   : > { %791 = dma.vmem_to_hbm [thread:$0]  (%p1264_p10), %s626_s5, 128, %s628_s29, %s613_s18  }
 0x1b6 PF: > { %s1596_s19 = sld [smem:[#allocation19_spill]]  ;;  %p809_p13 = scmp.ge.s32.totalorder %s1129_s7, 2 }
 0x1b8   : > { %p805_p7 = pnand %p809_p13, %p1270_p0 }
 0x1ba   : > { %p806_p4 = pneg %p805_p7 }
 0x1bc   : > { %s639_s16 = sand.u32 1, %s1596_s19  }
 0x1bd   : > { %s640_s24 = scalar_lea.sflag [#allocation7], %s639_s16 }
 0x1be   : > { %1080 = dma.done.wait (%p806_p4), %s640_s24, 128  }
 0x1bf   : > { %1082 = vsyncadd (%p806_p4), %s640_s24, 4294967168  ;;  %s32_s7 = sadd.s32 1, %s1129_s7   ;;  %s1598_s22 = sld [smem:[#allocation20_spill]] }
 0x1c0   : > { %p29_p1 = scmp.ge.s32.totalorder %s32_s7, 8   ;;  %s1599_s23 = sld [smem:[#allocation21_spill]] }
 0x1c1   : > { %s1600_s24 = sld [smem:[#allocation23_spill]]  ;;  %s1603_s25 = smov %s1101_s0 }
 0x1c2   : > { %s1601_s8 = sld [smem:[#allocation22_spill]]  ;;  %s1604_s0 = smov %s1105_s26 }
 0x1c3   : > { %s1602_s29 = sld [smem:[#allocation26_spill]]  ;;  %s1605_s26 = smov %s1346_s17 }
 0x1c4   : > { %s1606_s27 = smov %s1113_s28  ;;  %s1608_s30 = smov %s1125_s6 }
 0x1c5   : > { %s1609_s6 = smov %s1611_s10  ;;  %31 = sbr.rel (!%p29_p1) target bundleno = 17 (0x11), region = 108 }
 0x1c8   : > { %s1607_s28 = smov %s1601_s8 }
 0x1ca   :  { %646 = vsyncpa [#allocation6], 1 }
 0x1cb   :  { %648 = vsyncpa [#allocation6 + $0x1], 1 }
 0x1cc   :  { %649 = vsyncpa [#allocation9], 1 }
 0x1cd   :  { %651 = vsyncpa [#allocation9 + $0x1], 1 }
 0x1ce   :  { %652 = vsyncpa [#allocation7], 1 }
 0x1cf   :  { %654 = vsyncpa [#allocation7 + $0x1], 1 }

</bundles_post_ra>
